<compile_context>
chip_gen: v7x
topology: tpu7x:2x2x1
jax: 0.10.0
libtpu: 0.0.40
codegen_flags: <defaults>
</compile_context>

<pallas_src>
import functools

import jax
import jax.numpy as jnp
from jax.experimental import pallas as pl
from jax.experimental.pallas import tpu as pltpu


def _ce_stable_kernel(x_ref, lbl_ref, part_ref, *, eps, n_total):
    """One row tile: write the tile's partial sum of log(softmax + eps)[label]."""
    i = pl.program_id(0)

    x = x_ref[...]                                    # (tm, C), wire dtype
    labels = lbl_ref[...]                             # (tm, 1) int32
    tm, c = x.shape

    class_iota = jax.lax.broadcasted_iota(jnp.int32, (tm, c), 1)
    one_hot = class_iota == labels                    # (tm, C) bool

    # Row max and target-logit gather in the wire dtype (exact ops), then f32.
    m = jnp.max(x, axis=-1, keepdims=True).astype(jnp.float32)            # (tm,1)
    picked_x = jnp.sum(
        jnp.where(one_hot, x, jnp.zeros_like(x)), axis=-1, keepdims=True
    ).astype(jnp.float32)                                                 # (tm,1)

    # Stable softmax denominator in f32 (cast fused into the subtraction).
    e = jnp.exp(x.astype(jnp.float32) - m)                                # (tm,C)
    s = jnp.sum(e, axis=-1, keepdims=True)                                # (tm,1)

    # log(softmax + eps) only on the picked element: tm logs instead of tm*C.
    picked_e = jnp.exp(picked_x - m)                                      # (tm,1)
    logp = jnp.log(picked_e / s + eps)                                    # (tm,1)

    # Mask rows of the ragged last tile.  Must stay a select (not a multiply)
    # so garbage / NaN in out-of-bounds rows never enters the sum.
    row = jax.lax.broadcasted_iota(jnp.int32, (tm, 1), 0) + i * tm
    partial = jnp.sum(jnp.where(row < n_total, logp, 0.0))                # scalar

    # Dense (1, 8, 128) block per tile -> unmasked lane-dense store.
    part_ref[...] = jnp.broadcast_to(partial, part_ref.shape)


def cross_entropy_loss_stable(outputs, labels, eps=1e-5, block_rows=None):
    """outputs: [N, C] float (any dtype), labels: [N] int -> scalar f32 loss."""
    n, c = outputs.shape
    labels2d = labels.astype(jnp.int32).reshape(n, 1)

    itemsize = outputs.dtype.itemsize
    sub = 8 if itemsize >= 4 else 16          # sublane packing of the wire dtype

    # Row tile from a ~2 MiB wire-byte budget (amortizes ~0.35us/step overhead),
    # clamped and rounded down to the sublane multiple, capped by the batch.
    if block_rows is None:
        block_rows = (2 * 1024 * 1024) // max(1, c * itemsize)
    tm = max(sub, min(int(block_rows), 4096))
    tm = min(tm, pl.cdiv(n, sub) * sub)
    tm = (tm // sub) * sub
    num_tiles = pl.cdiv(n, tm)

    kernel = functools.partial(_ce_stable_kernel, eps=eps, n_total=n)

    cost = pl.CostEstimate(
        flops=6 * n * c,
        transcendentals=n * c + 2 * n,
        bytes_accessed=n * c * itemsize + n * 4 + num_tiles * 8 * 128 * 4,
    )

    # Explicit VMEM budget: double-buffered wire input + f32 temporaries,
    # clamped to stay legal on the 64 MiB-VMEM v7x while exceeding the small
    # scoped defaults on v5e/v6e when large tiles need the headroom.
    block_in_bytes = tm * c * itemsize
    vmem_est = 2 * block_in_bytes + 2 * tm * 4 + 4 * tm * c * 4 + 2 * 8 * 128 * 4
    vmem_limit = int(min(48 * 1024 * 1024, max(32 * 1024 * 1024, vmem_est)))

    partials = pl.pallas_call(
        kernel,
        out_shape=jax.ShapeDtypeStruct((num_tiles, 8, 128), jnp.float32),
        grid=(num_tiles,),
        in_specs=[
            pl.BlockSpec((tm, c), lambda i: (i, 0)),
            pl.BlockSpec((tm, 1), lambda i: (i, 0)),
        ],
        out_specs=pl.BlockSpec((1, 8, 128), lambda i: (i, 0, 0)),
        compiler_params=pltpu.CompilerParams(
            dimension_semantics=("parallel",),   # tiles are independent now
            vmem_limit_bytes=vmem_limit,
        ),
        cost_estimate=cost,
    )(outputs, labels2d)

    # reduction='mean' over the global batch size; final reduce in the wrapper
    # (numerically safer than a serial single-f32 accumulator, and lets the
    # grid axis be parallel for v7x megacore).
    return -jnp.sum(partials[:, 0, 0]) / jnp.float32(n)


def _reference(outputs, labels, eps=1e-5):
    p = jax.nn.softmax(outputs.astype(jnp.float32), axis=-1)
    logp = jnp.log(p + eps)
    picked = jnp.take_along_axis(logp, labels[:, None].astype(jnp.int32), axis=-1)[:, 0]
    return -jnp.mean(picked)


if __name__ == "__main__":
    key = jax.random.PRNGKey(0)
    k1, k2 = jax.random.split(key)

    # small case matching the module's forward: outputs [N, C], labels [N]
    N, C = 8, 32
    outputs = jax.random.normal(k1, (N, C), dtype=jnp.float32)
    labels = jax.random.randint(k2, (N,), 0, C, dtype=jnp.int32)

    loss = cross_entropy_loss_stable(outputs, labels, eps=1e-5)
    jax.block_until_ready(loss)
    ref = _reference(outputs, labels, eps=1e-5)
    assert jnp.allclose(loss, ref, atol=1e-5, rtol=1e-5), (loss, ref)

    # second check: multi-tile grid, ragged last block (no wrapper pad), bf16 wire
    k3, k4 = jax.random.split(k2)
    N2, C2 = 100, 256
    outputs2 = jax.random.normal(k3, (N2, C2), dtype=jnp.float32).astype(jnp.bfloat16)
    labels2 = jax.random.randint(k4, (N2,), 0, C2, dtype=jnp.int32)

    loss2 = cross_entropy_loss_stable(outputs2, labels2, eps=1e-5, block_rows=32)
    jax.block_until_ready(loss2)
    ref2 = _reference(outputs2, labels2, eps=1e-5)
    assert jnp.allclose(loss2, ref2, atol=1e-4, rtol=1e-4), (loss2, ref2)

    print("KERNEL_OK")
</pallas_src>

<mosaic_0001>
module attributes {stable_mosaic.version = 11 : i64} {
  func.func @_ce_stable_kernel(%arg0: i32, %arg1: memref<8x32xf32, #tpu.memory_space<vmem>>, %arg2: memref<8x1xi32, #tpu.memory_space<vmem>>, %arg3: memref<1x8x128xf32, #tpu.memory_space<vmem>>) attributes {dimension_semantics = [#tpu.dimension_semantics<parallel>], iteration_bounds = array<i64: 1>, scalar_prefetch = 0 : i64, scratch_operands = 0 : i64, tpu.core_type = #tpu.core_type<tc>, window_params = [{transform_indices = @transform_0, window_bounds = array<i64: 8, 32>}, {transform_indices = @transform_1, window_bounds = array<i64: 8, 1>}, {transform_indices = @transform_2, window_bounds = array<i64: 1, 8, 128>}]} {
    %c0 = arith.constant 0 : index
    %c0_0 = arith.constant 0 : index
    %0 = vector.load %arg1[%c0, %c0_0] : memref<8x32xf32, #tpu.memory_space<vmem>>, vector<8x32xf32>
    %c0_1 = arith.constant 0 : index
    %c0_2 = arith.constant 0 : index
    %1 = vector.load %arg2[%c0_1, %c0_2] : memref<8x1xi32, #tpu.memory_space<vmem>>, vector<8x1xi32>
    %2 = tpu.iota {dimensions = array<i32: 1>} : vector<8x32xi32>
    %3 = vector.broadcast %1 : vector<8x1xi32> to vector<8x32xi32>
    %4 = arith.cmpi eq, %2, %3 : vector<8x32xi32>
    %cst = arith.constant dense<0xFF800000> : vector<8xf32>
    %5 = vector.multi_reduction <maximumf>, %0, %cst [1] : vector<8x32xf32> to vector<8xf32>
    %6 = vector.shape_cast %5 : vector<8xf32> to vector<8x1xf32>
    %cst_3 = arith.constant 0.000000e+00 : f32
    %7 = vector.broadcast %cst_3 : f32 to vector<8x32xf32>
    %8 = arith.select %4, %0, %7 : vector<8x32xi1>, vector<8x32xf32>
    %cst_4 = arith.constant dense<0.000000e+00> : vector<8xf32>
    %9 = vector.multi_reduction <add>, %8, %cst_4 [1] : vector<8x32xf32> to vector<8xf32>
    %10 = vector.shape_cast %9 : vector<8xf32> to vector<8x1xf32>
    %11 = vector.broadcast %6 : vector<8x1xf32> to vector<8x32xf32>
    %12 = arith.subf %0, %11 : vector<8x32xf32>
    %13 = math.exp %12 : vector<8x32xf32>
    %cst_5 = arith.constant dense<0.000000e+00> : vector<8xf32>
    %14 = vector.multi_reduction <add>, %13, %cst_5 [1] : vector<8x32xf32> to vector<8xf32>
    %15 = vector.shape_cast %14 : vector<8xf32> to vector<8x1xf32>
    %16 = arith.subf %10, %6 : vector<8x1xf32>
    %17 = math.exp %16 : vector<8x1xf32>
    %18 = arith.divf %17, %15 : vector<8x1xf32>
    %cst_6 = arith.constant 9.99999974E-6 : f32
    %19 = vector.broadcast %cst_6 : f32 to vector<8x1xf32>
    %20 = arith.addf %18, %19 : vector<8x1xf32>
    %21 = math.log %20 : vector<8x1xf32>
    %22 = tpu.iota {dimensions = array<i32: 0>} : vector<8x1xi32>
    %c8_i32 = arith.constant 8 : i32
    %23 = arith.muli %arg0, %c8_i32 : i32
    %24 = vector.broadcast %23 : i32 to vector<8x1xi32>
    %25 = arith.addi %22, %24 : vector<8x1xi32>
    %c8_i32_7 = arith.constant 8 : i32
    %26 = vector.broadcast %c8_i32_7 : i32 to vector<8x1xi32>
    %27 = arith.cmpi slt, %25, %26 : vector<8x1xi32>
    %cst_8 = arith.constant 0.000000e+00 : f32
    %28 = vector.broadcast %cst_8 : f32 to vector<8x1xf32>
    %29 = arith.select %27, %21, %28 : vector<8x1xi1>, vector<8x1xf32>
    %30 = vector.shape_cast %29 : vector<8x1xf32> to vector<1x8x1xf32>
    %cst_9 = arith.constant dense<0.000000e+00> : vector<1xf32>
    %31 = vector.multi_reduction <add>, %30, %cst_9 [1, 2] : vector<1x8x1xf32> to vector<1xf32>
    %32 = vector.shape_cast %31 : vector<1xf32> to vector<1x1x1xf32>
    %33 = vector.extract %32[0, 0, 0] : f32 from vector<1x1x1xf32>
    %34 = vector.broadcast %33 : f32 to vector<1x8x128xf32>
    %c0_10 = arith.constant 0 : index
    %c0_11 = arith.constant 0 : index
    %c0_12 = arith.constant 0 : index
    %35 = vector.load %arg3[%c0_10, %c0_11, %c0_12] : memref<1x8x128xf32, #tpu.memory_space<vmem>>, vector<1x8x128xf32>
    tpu.vector_store %arg3[%c0_10, %c0_11, %c0_12], %34 {strides = array<i32>} : memref<1x8x128xf32, #tpu.memory_space<vmem>>, vector<1x8x128xf32>,
    return
  }
  func.func @transform_0(%arg0: i32) -> (i32, i32) {
    %c0_i32 = arith.constant 0 : i32
    %c0_i32_0 = arith.constant 0 : i32
    return %arg0, %c0_i32 : i32, i32
  }
  func.func @transform_1(%arg0: i32) -> (i32, i32) {
    %c0_i32 = arith.constant 0 : i32
    %c0_i32_0 = arith.constant 0 : i32
    return %arg0, %c0_i32 : i32, i32
  }
  func.func @transform_2(%arg0: i32) -> (i32, i32, i32) {
    %c0_i32 = arith.constant 0 : i32
    %c0_i32_0 = arith.constant 0 : i32
    %c0_i32_1 = arith.constant 0 : i32
    return %arg0, %c0_i32, %c0_i32_0 : i32, i32, i32
  }
}

</mosaic_0001>

<bundles_post_ra>
// kernel: tpu_custom_call.1
= control target key start
LH: loop header
LB: loop body
LE: loop exit
PB: predicated region body
PF: predicated region fallthrough
CT: control target
= control target key end

     0   :  { %vm20_vm0 = vcmask 261120   ;;  %s151_s0 = inlined_call_operand.vmem [shape: f32[8,32], index: 0, kind: input, shape index: {}]   ;;  %s152_s1 = inlined_call_operand.vmem [shape: s32[8,1], index: 1, kind: input, shape index: {}]   ;;  %s153_s2 = inlined_call_operand.hbm [shape: f32[1,8,128], index: 2, kind: output, shape index: {}]  }
   0x1   :  { %v12_v0 = vld [vmem:[%s151_s0] sm:$0xff] }
   0x2   :  { %7 = vsyncpa [#allocation3], 0  ;;  %v21_v1 = vsel %vm20_vm0, %v12_v0, -inf  ;;  %v113_v2 = vmov 0   ;;  %v13_v3 = vld [vmem:[%s152_s1] sm:$0xff]  ;;  %v14_v6 = vlaneseq  ;;  %vm49_vm2 = vcmask 7168  }
   0x3   :  { %80 = vset.pattern.permute.xlu0 %v113_v2  ;;  %s114_s0 = smov [#allocation2]  }
   0x4   :  { %22 = vmax.xlane.f32.xlu0 %v21_v1  ;;  %v15_v8 = vand.u32 127, %v14_v6  ;;  %s68_s1 = sshll.u32 %s114_s0, 4  ;;  %s69_s1 = int_to_ptr.vmem [resolvable:$true] %s68_s1 }
   0x5   :  { %s89_s14 = scalar_lea.vmem %s69_s1, 128  ;;  %p94_p1 = scmp.lt.s32.totalorder %s69_s1, %s69_s1 }
   0x6   :  { %p90_p0 = scmp.ne.s32.totalorder %s69_s1, %s89_s14  ;;  %p95_p2 = scmp.lt.s32.totalorder %s89_s14, %s89_s14 }
   0x8   :  { %p96_p3 = por %p95_p2, %p94_p1 }
   0xa   :  { %p97_p4 = pnand %p96_p3, %p90_p0 }
  0x1a   :  { %17 = vperm.xlu0 %80, %v13_v3  }
  0x91   :  { %v23_v4 = vpop.xlane.xlu0 %22 }
  0x92   :  { %v28_v5 = vsub.f32 %v12_v0, %v23_v4 }
  0x94   :  { %v29_v7 = vmul.f32 1.442695, %v28_v5 }
  0x96   :  { %81 = vpow2.f32 %v29_v7 }
  0x99   :  { %v18_v9 = vpop.permute.xlu0 %17 }
  0x9a   :  { %vm19_vm1 = vcmp.eq.s32.totalorder %v15_v8, %v18_v9 }
  0x9b   :  { %v24_v10 = vsel %vm19_vm1, %v12_v0, 0.0 }
  0x9c   :  { %v25_v11 = vsel %vm20_vm0, %v24_v10, 0.0 }
  0x9d   :  { %26 = vadd.xlane.f32.xlu1 %v25_v11 }
  0xa0   :  { %v82_v12 = vpop.eup %81 }
  0xa1   :  { %v31_v13 = vsel %vm20_vm0, %v82_v12, 0.0 }
  0xa2   :  { %32 = vadd.xlane.f32.xlu1 %v31_v13 }
 0x12a   :  { %v27_v14 = vpop.xlane.xlu1 %26 }
 0x12b   :  { %v34_v15 = vsub.f32 %v27_v14, %v23_v4 }
 0x12d   :  { %v35_v16 = vmul.f32 1.442695, %v34_v15 }
 0x12f   :  { %83 = vpow2.f32 %v35_v16  ;;  %v33_v17 = vpop.xlane.xlu1 %32 }
 0x130   :  { %85 = vrcp.f32 %v33_v17 }
 0x139   :  { %v84_v18 = vpop.eup %83 }
 0x13a   :  { %v86_v19 = vpop.eup %85 }
 0x13b   :  { %v38_v20 = vmul.f32 %v86_v19, %v84_v18 }
 0x13d   :  { %v39_v21 = vadd.f32 1e-05, %v38_v20 }
 0x13f   :  { %87 = vlog2.f32 %v39_v21 }
 0x149   :  { %v88_v22 = vpop.eup %87 }
 0x14a   :  { %v41_v23 = vmul.f32 0.6931472, %v88_v22 }
 0x14c   :  { %v50_v24 = vsel %vm49_vm2, %v41_v23, 0.0 }
 0x14d   :  { %51 = vadd.xlane.f32.xlu1 %v50_v24 }
 0x1da   :  { %v52_v25 = vpop.xlane.xlu1 %51 }
 0x1db   :  { %v53_v26 = vrot.slane %v52_v25, 4 }
 0x1dd   :  { %v54_v27 = vadd.f32 %v53_v26, %v52_v25 }
 0x1df   :  { %v55_v28 = vrot.slane %v54_v27, 2 }
 0x1e1   :  { %v56_v29 = vadd.f32 %v55_v28, %v54_v27 }
 0x1e3   :  { %v57_v30 = vrot.slane %v56_v29, 1 }
 0x1e5   :  { %v58_v31 = vadd.f32 %v57_v30, %v56_v29 }
 0x1e7   :  { %76 = vpush %v58_v31 }
 0x218   :  { %s77_s13 = spop %76 }
 0x219   :  { %v60_v32 = vstv %s77_s13 }
 0x21a   :  { %61 = vst [vmem:[#allocation2] sm:$0xff] %v60_v32 }
 0x21b   :  { %100 = shalt.err (!%p97_p4)
}
 0x21c   :  { %s101_s17 = scalar_lea.hbm %s153_s2, 128 }
 0x21d   :  { %p102_p5 = scmp.ne.s32.totalorder %s153_s2, %s101_s17  ;;  %p105_p6 = scmp.lt.u32.totalorder %s101_s17, %s153_s2 }
 0x21f   :  { %p107_p7 = pnand %p105_p6, %p102_p5 }
 0x221   :  { %110 = shalt.err (!%p107_p7)
}
 0x222   :  { %71 = dma.vmem_to_hbm [thread:$0]  %s69_s1, 128, %s153_s2, [#allocation3]  }
 0x223   :  { %111 = dma.done.wait [#allocation3], 128  }
 0x224   :  { %112 = vsyncadd [#allocation3], 4294967168 }
 0x225   :  { %75 = vsyncpa [#allocation3], 1 }

</bundles_post_ra>
